<compile_context>
chip_gen: v5e
topology: v5e:2x2
jax: 0.10.0
libtpu: 0.0.40
codegen_flags: <defaults>
</compile_context>

<pallas_src>
import jax
import jax.numpy as jnp
from jax.experimental import pallas as pl
from jax.experimental.pallas import tpu as pltpu

_LN_EPS = 1e-6
_GELU_C = 0.7978845608028654  # sqrt(2/pi)


def _ffn2d_kernel(scale_ref, x_ref, w1_ref, ln1w_ref, ln1b_ref,
                  w2_ref, ln2w_ref, ln2b_ref, gamma_ref, o_ref):
    b = pl.program_id(0)
    xin = x_ref[0]                                        # (C, TL), native dtype
    x32 = xin.astype(jnp.float32)

    # --- Conv2d_LN #1: 1x1 conv (channel matmul) + LayerNorm over channels ---
    h = jnp.dot(w1_ref[...], xin, preferred_element_type=jnp.float32)  # (mid, TL)
    inv_m = 1.0 / h.shape[0]
    mu = jnp.sum(h, axis=0, keepdims=True) * inv_m
    ex2 = jnp.sum(h * h, axis=0, keepdims=True) * inv_m
    var = ex2 - mu * mu
    h = (h - mu) * jax.lax.rsqrt(var + _LN_EPS)
    h = h * ln1w_ref[...] + ln1b_ref[...]

    # --- GELU (tanh approximation) ---
    # TODO(synk): torch nn.GELU() is erf-based; tanh approximation used here to
    # avoid relying on an erf lowering inside Mosaic (difference is ~1e-3).
    h = 0.5 * h * (1.0 + jnp.tanh(_GELU_C * (h + 0.044715 * h * h * h)))

    # --- Conv2d_LN #2: 1x1 conv back to C channels + LayerNorm over channels ---
    y = jnp.dot(w2_ref[...], h.astype(w2_ref.dtype),
                preferred_element_type=jnp.float32)        # (C, TL)
    inv_c = 1.0 / y.shape[0]
    mu2 = jnp.sum(y, axis=0, keepdims=True) * inv_c
    ex2_2 = jnp.sum(y * y, axis=0, keepdims=True) * inv_c
    var2 = ex2_2 - mu2 * mu2
    y = (y - mu2) * jax.lax.rsqrt(var2 + _LN_EPS)
    y = y * ln2w_ref[...] + ln2b_ref[...]

    # --- Residual + layer-scale gamma + per-sample DropPath scale ------------
    # DropPath keep/drop and the 1/keep_prob scaling are folded into scale_ref,
    # so this is a single fused broadcast multiply-add.
    o_ref[0] = (x32 + (gamma_ref[...] * scale_ref[b]) * y).astype(o_ref.dtype)


def _pick_lane_tile(hw, c, mid, vmem_budget_bytes=12 << 20):
    """Largest lane-aligned divisor of H*W fitting a conservative VMEM budget."""
    if hw % 128 != 0:
        return hw  # full extent (Pallas allows block dim == full array dim)
    # rough f32 bytes per lane: x/out blocks (double-buffered) + f32 intermediates
    per_lane = 4 * (4 * c + 2 * mid + 4)
    cap = max(128, (vmem_budget_bytes // per_lane) // 128 * 128)
    best, tl = 128, 128
    while tl <= hw and tl <= cap:
        if hw % tl == 0:
            best = tl
        tl += 128
    return best


def ffn2d_forward(x, params, *, drop_path_rate=0.0, training=False, key=None):
    """Forward pass of FFN2d (channel_mixer Residual) for NCHW input x."""
    if isinstance(x, tuple):
        return (ffn2d_forward(x[0], params, drop_path_rate=drop_path_rate,
                              training=training, key=key), x[1])

    B, C, H, W = x.shape
    HW = H * W
    mid = params["w1"].shape[0]

    # Per-sample DropPath scale in float32 (SMEM scalars are 32-bit).
    if training and drop_path_rate is not None and drop_path_rate > 0.0:
        keep_prob = 1.0 - float(drop_path_rate)
        u = jax.random.uniform(key, (B,), dtype=jnp.float32)
        scale = jnp.floor(keep_prob + u) / keep_prob
    else:
        scale = jnp.ones((B,), dtype=jnp.float32)

    x3 = x.reshape(B, C, HW)          # free reshape of contiguous NCHW
    TL = _pick_lane_tile(HW, C, mid)

    # Conv weights in the activation dtype (bf16 keeps the MXU fast path);
    # LayerNorm affine params and layer-scale gamma stay float32.
    wdt = x.dtype if x.dtype in (jnp.bfloat16, jnp.float32) else jnp.float32
    w1 = params["w1"].astype(wdt)                          # (mid, C)
    w2 = params["w2"].astype(wdt)                          # (C, mid)
    ln1w = params["ln1_w"].reshape(mid, 1).astype(jnp.float32)
    ln1b = params["ln1_b"].reshape(mid, 1).astype(jnp.float32)
    ln2w = params["ln2_w"].reshape(C, 1).astype(jnp.float32)
    ln2b = params["ln2_b"].reshape(C, 1).astype(jnp.float32)
    gamma = params["gamma"].reshape(C, 1).astype(jnp.float32)

    out3 = pl.pallas_call(
        _ffn2d_kernel,
        out_shape=jax.ShapeDtypeStruct((B, C, HW), x.dtype),
        grid=(B, HW // TL),
        in_specs=[
            pl.BlockSpec(memory_space=pltpu.MemorySpace.SMEM),     # scale (B,)
            pl.BlockSpec((1, C, TL), lambda b, s: (b, 0, s)),      # x
            pl.BlockSpec((mid, C), lambda b, s: (0, 0)),           # w1
            pl.BlockSpec((mid, 1), lambda b, s: (0, 0)),           # ln1 weight
            pl.BlockSpec((mid, 1), lambda b, s: (0, 0)),           # ln1 bias
            pl.BlockSpec((C, mid), lambda b, s: (0, 0)),           # w2
            pl.BlockSpec((C, 1), lambda b, s: (0, 0)),             # ln2 weight
            pl.BlockSpec((C, 1), lambda b, s: (0, 0)),             # ln2 bias
            pl.BlockSpec((C, 1), lambda b, s: (0, 0)),             # gamma
        ],
        out_specs=pl.BlockSpec((1, C, TL), lambda b, s: (b, 0, s)),
        compiler_params=pltpu.CompilerParams(
            dimension_semantics=("parallel", "parallel")),
    )(scale, x3, w1, ln1w, ln1b, w2, ln2w, ln2b, gamma)

    return out3.reshape(B, C, H, W)


# ----------------------------- pure-JAX reference ----------------------------
def _gelu_tanh(v):
    return 0.5 * v * (1.0 + jnp.tanh(_GELU_C * (v + 0.044715 * v * v * v)))


def ffn2d_reference(x, params, scale):
    B, C, H, W = x.shape
    xm = x.reshape(B, C, H * W).astype(jnp.float32)
    h = jnp.einsum("md,bdn->bmn", params["w1"], xm)
    mu = h.mean(axis=1, keepdims=True)
    var = ((h - mu) ** 2).mean(axis=1, keepdims=True)
    h = (h - mu) / jnp.sqrt(var + _LN_EPS)
    h = h * params["ln1_w"][None, :, None] + params["ln1_b"][None, :, None]
    h = _gelu_tanh(h)
    y = jnp.einsum("dm,bmn->bdn", params["w2"], h)
    mu2 = y.mean(axis=1, keepdims=True)
    var2 = ((y - mu2) ** 2).mean(axis=1, keepdims=True)
    y = (y - mu2) / jnp.sqrt(var2 + _LN_EPS)
    y = y * params["ln2_w"][None, :, None] + params["ln2_b"][None, :, None]
    out = xm + params["gamma"][None, :, None] * scale[:, None, None] * y
    return out.reshape(B, C, H, W).astype(x.dtype)


if __name__ == "__main__":
    key = jax.random.PRNGKey(0)
    ks = jax.random.split(key, 8)

    B, dim, H, W = 2, 4, 16, 16
    ratio = 4
    mid = ratio * dim
    layer_scale_init_value = 0.1   # non-tiny value so the residual branch is exercised

    x = jax.random.normal(ks[0], (B, dim, H, W), dtype=jnp.float32)
    params = {
        "w1": 0.2 * jax.random.normal(ks[1], (mid, dim), dtype=jnp.float32),
        "ln1_w": 1.0 + 0.1 * jax.random.normal(ks[2], (mid,), dtype=jnp.float32),
        "ln1_b": 0.1 * jax.random.normal(ks[3], (mid,), dtype=jnp.float32),
        "w2": 0.2 * jax.random.normal(ks[4], (dim, mid), dtype=jnp.float32),
        "ln2_w": 1.0 + 0.1 * jax.random.normal(ks[5], (dim,), dtype=jnp.float32),
        "ln2_b": 0.1 * jax.random.normal(ks[6], (dim,), dtype=jnp.float32),
        "gamma": layer_scale_init_value * jnp.ones((dim,), dtype=jnp.float32),
    }

    # 1) Default FFN2d config (drop_path=0.0 -> Identity), eval-style call.
    y = ffn2d_forward(x, params, drop_path_rate=0.0, training=False)
    y = jax.block_until_ready(y)
    ref = ffn2d_reference(x, params, jnp.ones((B,), jnp.float32))
    assert y.shape == x.shape and y.dtype == x.dtype
    assert jnp.allclose(y, ref, rtol=1e-4, atol=1e-4), "FFN2d kernel mismatch (no drop-path)"

    # 2) Training with drop_path > 0: per-sample stochastic-depth scale.
    p = 0.25
    y2 = ffn2d_forward(x, params, drop_path_rate=p, training=True, key=ks[7])
    y2 = jax.block_until_ready(y2)
    keep_prob = 1.0 - p
    u = jax.random.uniform(ks[7], (B,), dtype=jnp.float32)
    scale = jnp.floor(keep_prob + u) / keep_prob
    ref2 = ffn2d_reference(x, params, scale)
    assert jnp.allclose(y2, ref2, rtol=1e-4, atol=1e-4), "FFN2d kernel mismatch (drop-path)"

    # 3) Tuple-input path passes the auxiliary element through untouched.
    aux = jnp.arange(3, dtype=jnp.float32)
    yt = ffn2d_forward((x, aux), params, drop_path_rate=0.0, training=False)
    yt0 = jax.block_until_ready(yt[0])
    assert jnp.allclose(yt0, ref, rtol=1e-4, atol=1e-4)
    assert jnp.array_equal(yt[1], aux)

    print("KERNEL_OK")
</pallas_src>

<mosaic_0001>
module attributes {stable_mosaic.version = 11 : i64} {
  func.func @_ffn2d_kernel(%arg0: i32, %arg1: i32, %arg2: memref<2xf32, #tpu.memory_space<smem>>, %arg3: memref<1x4x256xf32, #tpu.memory_space<vmem>>, %arg4: memref<16x4xf32, #tpu.memory_space<vmem>>, %arg5: memref<16x1xf32, #tpu.memory_space<vmem>>, %arg6: memref<16x1xf32, #tpu.memory_space<vmem>>, %arg7: memref<4x16xf32, #tpu.memory_space<vmem>>, %arg8: memref<4x1xf32, #tpu.memory_space<vmem>>, %arg9: memref<4x1xf32, #tpu.memory_space<vmem>>, %arg10: memref<4x1xf32, #tpu.memory_space<vmem>>, %arg11: memref<1x4x256xf32, #tpu.memory_space<vmem>>) attributes {dimension_semantics = [#tpu.dimension_semantics<parallel>, #tpu.dimension_semantics<parallel>], iteration_bounds = array<i64: 2, 1>, scalar_prefetch = 0 : i64, scratch_operands = 0 : i64, tpu.core_type = #tpu.core_type<tc>, window_params = [{transform_indices = @transform_0, window_bounds = array<i64: 2>}, {transform_indices = @transform_1, window_bounds = array<i64: 1, 4, 256>}, {pipeline_mode = #tpu.pipeline_mode<synchronous>, transform_indices = @transform_2, window_bounds = array<i64: 16, 4>}, {pipeline_mode = #tpu.pipeline_mode<synchronous>, transform_indices = @transform_3, window_bounds = array<i64: 16, 1>}, {pipeline_mode = #tpu.pipeline_mode<synchronous>, transform_indices = @transform_4, window_bounds = array<i64: 16, 1>}, {pipeline_mode = #tpu.pipeline_mode<synchronous>, transform_indices = @transform_5, window_bounds = array<i64: 4, 16>}, {pipeline_mode = #tpu.pipeline_mode<synchronous>, transform_indices = @transform_6, window_bounds = array<i64: 4, 1>}, {pipeline_mode = #tpu.pipeline_mode<synchronous>, transform_indices = @transform_7, window_bounds = array<i64: 4, 1>}, {pipeline_mode = #tpu.pipeline_mode<synchronous>, transform_indices = @transform_8, window_bounds = array<i64: 4, 1>}, {transform_indices = @transform_9, window_bounds = array<i64: 1, 4, 256>}]} {
    %c0 = arith.constant 0 : index
    %c0_0 = arith.constant 0 : index
    %c0_1 = arith.constant 0 : index
    %0 = vector.load %arg3[%c0, %c0_0, %c0_1] : memref<1x4x256xf32, #tpu.memory_space<vmem>>, vector<1x4x256xf32>
    %1 = vector.shape_cast %0 : vector<1x4x256xf32> to vector<4x256xf32>
    %c0_2 = arith.constant 0 : index
    %c0_3 = arith.constant 0 : index
    %2 = vector.load %arg4[%c0_2, %c0_3] : memref<16x4xf32, #tpu.memory_space<vmem>>, vector<16x4xf32>
    %cst = arith.constant dense<0.000000e+00> : vector<16x256xf32>
    %3 = tpu.matmul %2, %1, %cst {dimension_numbers = #tpu.dot_dimension_numbers<[1], [0], [0], [1], [0, 0, 1, 1], [], []>} : vector<16x4xf32>, vector<4x256xf32>, vector<16x256xf32> -> vector<16x256xf32>
    %cst_4 = arith.constant dense<0.000000e+00> : vector<256xf32>
    %4 = vector.multi_reduction <add>, %3, %cst_4 [0] : vector<16x256xf32> to vector<256xf32>
    %5 = vector.shape_cast %4 : vector<256xf32> to vector<1x256xf32>
    %cst_5 = arith.constant 6.250000e-02 : f32
    %6 = vector.broadcast %cst_5 : f32 to vector<1x256xf32>
    %7 = arith.mulf %5, %6 : vector<1x256xf32>
    %8 = arith.mulf %3, %3 : vector<16x256xf32>
    %cst_6 = arith.constant dense<0.000000e+00> : vector<256xf32>
    %9 = vector.multi_reduction <add>, %8, %cst_6 [0] : vector<16x256xf32> to vector<256xf32>
    %10 = vector.shape_cast %9 : vector<256xf32> to vector<1x256xf32>
    %cst_7 = arith.constant 6.250000e-02 : f32
    %11 = vector.broadcast %cst_7 : f32 to vector<1x256xf32>
    %12 = arith.mulf %10, %11 : vector<1x256xf32>
    %13 = arith.mulf %7, %7 : vector<1x256xf32>
    %14 = arith.subf %12, %13 : vector<1x256xf32>
    %15 = vector.broadcast %7 : vector<1x256xf32> to vector<16x256xf32>
    %16 = arith.subf %3, %15 : vector<16x256xf32>
    %cst_8 = arith.constant 9.99999997E-7 : f32
    %17 = vector.broadcast %cst_8 : f32 to vector<1x256xf32>
    %18 = arith.addf %14, %17 : vector<1x256xf32>
    %19 = math.rsqrt %18 : vector<1x256xf32>
    %20 = vector.broadcast %19 : vector<1x256xf32> to vector<16x256xf32>
    %21 = arith.mulf %16, %20 : vector<16x256xf32>
    %c0_9 = arith.constant 0 : index
    %c0_10 = arith.constant 0 : index
    %22 = vector.load %arg5[%c0_9, %c0_10] : memref<16x1xf32, #tpu.memory_space<vmem>>, vector<16x1xf32>
    %23 = vector.broadcast %22 : vector<16x1xf32> to vector<16x256xf32>
    %24 = arith.mulf %21, %23 : vector<16x256xf32>
    %c0_11 = arith.constant 0 : index
    %c0_12 = arith.constant 0 : index
    %25 = vector.load %arg6[%c0_11, %c0_12] : memref<16x1xf32, #tpu.memory_space<vmem>>, vector<16x1xf32>
    %26 = vector.broadcast %25 : vector<16x1xf32> to vector<16x256xf32>
    %27 = arith.addf %24, %26 : vector<16x256xf32>
    %cst_13 = arith.constant 5.000000e-01 : f32
    %28 = vector.broadcast %cst_13 : f32 to vector<16x256xf32>
    %29 = arith.mulf %28, %27 : vector<16x256xf32>
    %cst_14 = arith.constant 4.471500e-02 : f32
    %30 = vector.broadcast %cst_14 : f32 to vector<16x256xf32>
    %31 = arith.mulf %30, %27 : vector<16x256xf32>
    %32 = arith.mulf %31, %27 : vector<16x256xf32>
    %33 = arith.mulf %32, %27 : vector<16x256xf32>
    %34 = arith.addf %27, %33 : vector<16x256xf32>
    %cst_15 = arith.constant 0.797884583 : f32
    %35 = vector.broadcast %cst_15 : f32 to vector<16x256xf32>
    %36 = arith.mulf %35, %34 : vector<16x256xf32>
    %37 = math.tanh %36 : vector<16x256xf32>
    %cst_16 = arith.constant 1.000000e+00 : f32
    %38 = vector.broadcast %cst_16 : f32 to vector<16x256xf32>
    %39 = arith.addf %38, %37 : vector<16x256xf32>
    %40 = arith.mulf %29, %39 : vector<16x256xf32>
    %c0_17 = arith.constant 0 : index
    %c0_18 = arith.constant 0 : index
    %41 = vector.load %arg7[%c0_17, %c0_18] : memref<4x16xf32, #tpu.memory_space<vmem>>, vector<4x16xf32>
    %cst_19 = arith.constant dense<0.000000e+00> : vector<4x256xf32>
    %42 = tpu.matmul %41, %40, %cst_19 {dimension_numbers = #tpu.dot_dimension_numbers<[1], [0], [0], [1], [0, 0, 1, 1], [], []>} : vector<4x16xf32>, vector<16x256xf32>, vector<4x256xf32> -> vector<4x256xf32>
    %cst_20 = arith.constant dense<0.000000e+00> : vector<256xf32>
    %43 = vector.multi_reduction <add>, %42, %cst_20 [0] : vector<4x256xf32> to vector<256xf32>
    %44 = vector.shape_cast %43 : vector<256xf32> to vector<1x256xf32>
    %cst_21 = arith.constant 2.500000e-01 : f32
    %45 = vector.broadcast %cst_21 : f32 to vector<1x256xf32>
    %46 = arith.mulf %44, %45 : vector<1x256xf32>
    %47 = arith.mulf %42, %42 : vector<4x256xf32>
    %cst_22 = arith.constant dense<0.000000e+00> : vector<256xf32>
    %48 = vector.multi_reduction <add>, %47, %cst_22 [0] : vector<4x256xf32> to vector<256xf32>
    %49 = vector.shape_cast %48 : vector<256xf32> to vector<1x256xf32>
    %cst_23 = arith.constant 2.500000e-01 : f32
    %50 = vector.broadcast %cst_23 : f32 to vector<1x256xf32>
    %51 = arith.mulf %49, %50 : vector<1x256xf32>
    %52 = arith.mulf %46, %46 : vector<1x256xf32>
    %53 = arith.subf %51, %52 : vector<1x256xf32>
    %54 = vector.broadcast %46 : vector<1x256xf32> to vector<4x256xf32>
    %55 = arith.subf %42, %54 : vector<4x256xf32>
    %cst_24 = arith.constant 9.99999997E-7 : f32
    %56 = vector.broadcast %cst_24 : f32 to vector<1x256xf32>
    %57 = arith.addf %53, %56 : vector<1x256xf32>
    %58 = math.rsqrt %57 : vector<1x256xf32>
    %59 = vector.broadcast %58 : vector<1x256xf32> to vector<4x256xf32>
    %60 = arith.mulf %55, %59 : vector<4x256xf32>
    %c0_25 = arith.constant 0 : index
    %c0_26 = arith.constant 0 : index
    %61 = vector.load %arg8[%c0_25, %c0_26] : memref<4x1xf32, #tpu.memory_space<vmem>>, vector<4x1xf32>
    %62 = vector.broadcast %61 : vector<4x1xf32> to vector<4x256xf32>
    %63 = arith.mulf %60, %62 : vector<4x256xf32>
    %c0_27 = arith.constant 0 : index
    %c0_28 = arith.constant 0 : index
    %64 = vector.load %arg9[%c0_27, %c0_28] : memref<4x1xf32, #tpu.memory_space<vmem>>, vector<4x1xf32>
    %65 = vector.broadcast %64 : vector<4x1xf32> to vector<4x256xf32>
    %66 = arith.addf %63, %65 : vector<4x256xf32>
    %c0_29 = arith.constant 0 : index
    %c0_30 = arith.constant 0 : index
    %67 = vector.load %arg10[%c0_29, %c0_30] : memref<4x1xf32, #tpu.memory_space<vmem>>, vector<4x1xf32>
    %68 = arith.index_cast %arg0 : i32 to index
    %69 = memref.load %arg2[%68] : memref<2xf32, #tpu.memory_space<smem>>
    %70 = vector.broadcast %69 : f32 to vector<4x1xf32>
    %71 = arith.mulf %67, %70 : vector<4x1xf32>
    %72 = vector.broadcast %71 : vector<4x1xf32> to vector<4x256xf32>
    %73 = arith.mulf %72, %66 : vector<4x256xf32>
    %74 = arith.addf %1, %73 : vector<4x256xf32>
    %c0_31 = arith.constant 0 : index
    %c0_32 = arith.constant 0 : index
    %c0_33 = arith.constant 0 : index
    %75 = vector.load %arg11[%c0_31, %c0_32, %c0_33] : memref<1x4x256xf32, #tpu.memory_space<vmem>>, vector<1x4x256xf32>
    %76 = vector.shape_cast %75 : vector<1x4x256xf32> to vector<4x256xf32>
    %77 = vector.shape_cast %74 : vector<4x256xf32> to vector<1x4x256xf32>
    tpu.vector_store %arg11[%c0_31, %c0_32, %c0_33], %77 {strides = array<i32>} : memref<1x4x256xf32, #tpu.memory_space<vmem>>, vector<1x4x256xf32>,
    return
  }
  func.func @transform_0(%arg0: i32, %arg1: i32) -> i32 {
    %c0_i32 = arith.constant 0 : i32
    %c0_i32_0 = arith.constant 0 : i32
    return %c0_i32 : i32
  }
  func.func @transform_1(%arg0: i32, %arg1: i32) -> (i32, i32, i32) {
    %c0_i32 = arith.constant 0 : i32
    %c0_i32_0 = arith.constant 0 : i32
    return %arg0, %c0_i32, %arg1 : i32, i32, i32
  }
  func.func @transform_2(%arg0: i32, %arg1: i32) -> (i32, i32) {
    %c0_i32 = arith.constant 0 : i32
    %c0_i32_0 = arith.constant 0 : i32
    %c0_i32_1 = arith.constant 0 : i32
    return %c0_i32, %c0_i32_0 : i32, i32
  }
  func.func @transform_3(%arg0: i32, %arg1: i32) -> (i32, i32) {
    %c0_i32 = arith.constant 0 : i32
    %c0_i32_0 = arith.constant 0 : i32
    %c0_i32_1 = arith.constant 0 : i32
    return %c0_i32, %c0_i32_0 : i32, i32
  }
  func.func @transform_4(%arg0: i32, %arg1: i32) -> (i32, i32) {
    %c0_i32 = arith.constant 0 : i32
    %c0_i32_0 = arith.constant 0 : i32
    %c0_i32_1 = arith.constant 0 : i32
    return %c0_i32, %c0_i32_0 : i32, i32
  }
  func.func @transform_5(%arg0: i32, %arg1: i32) -> (i32, i32) {
    %c0_i32 = arith.constant 0 : i32
    %c0_i32_0 = arith.constant 0 : i32
    %c0_i32_1 = arith.constant 0 : i32
    return %c0_i32, %c0_i32_0 : i32, i32
  }
  func.func @transform_6(%arg0: i32, %arg1: i32) -> (i32, i32) {
    %c0_i32 = arith.constant 0 : i32
    %c0_i32_0 = arith.constant 0 : i32
    %c0_i32_1 = arith.constant 0 : i32
    return %c0_i32, %c0_i32_0 : i32, i32
  }
  func.func @transform_7(%arg0: i32, %arg1: i32) -> (i32, i32) {
    %c0_i32 = arith.constant 0 : i32
    %c0_i32_0 = arith.constant 0 : i32
    %c0_i32_1 = arith.constant 0 : i32
    return %c0_i32, %c0_i32_0 : i32, i32
  }
  func.func @transform_8(%arg0: i32, %arg1: i32) -> (i32, i32) {
    %c0_i32 = arith.constant 0 : i32
    %c0_i32_0 = arith.constant 0 : i32
    %c0_i32_1 = arith.constant 0 : i32
    return %c0_i32, %c0_i32_0 : i32, i32
  }
  func.func @transform_9(%arg0: i32, %arg1: i32) -> (i32, i32, i32) {
    %c0_i32 = arith.constant 0 : i32
    %c0_i32_0 = arith.constant 0 : i32
    return %arg0, %c0_i32, %arg1 : i32, i32, i32
  }
}

</mosaic_0001>

<bundles_post_ra>
// kernel: tpu_custom_call.1
= control target key start
LH: loop header
LB: loop body
LE: loop exit
PB: predicated region body
PF: predicated region fallthrough
CT: control target
= control target key end

     0   :  { %14 = vsyncpa [#allocation4], 0  ;;  %s1269_s0 = inlined_call_operand.vmem [shape: f32[2], index: 0, kind: input, shape index: {}]   ;;  %s1270_s1 = inlined_call_operand.vmem [shape: f32[2,4,256], index: 1, kind: input, shape index: {}]   ;;  %s1271_s2 = inlined_call_operand.vmem [shape: f32[16,4], index: 2, kind: input, shape index: {}]   ;;  %s1272_s3 = inlined_call_operand.vmem [shape: f32[16,1], index: 3, kind: input, shape index: {}]   ;;  %s1273_s4 = inlined_call_operand.vmem [shape: f32[16,1], index: 4, kind: input, shape index: {}]   ;;  %s1274_s5 = inlined_call_operand.vmem [shape: f32[4,16], index: 5, kind: input, shape index: {}]   ;;  %s1275_s6 = inlined_call_operand.vmem [shape: f32[4,1], index: 6, kind: input, shape index: {}]   ;;  %s1276_s7 = inlined_call_operand.vmem [shape: f32[4,1], index: 7, kind: input, shape index: {}]   ;;  %s1277_s8 = inlined_call_operand.vmem [shape: f32[4,1], index: 8, kind: input, shape index: {}]   ;;  %s1278_s9 = inlined_call_operand.hbm [shape: f32[2,4,256], index: 9, kind: output, shape index: {}]  }
   0x1   :  { %15 = vsyncpa [#allocation3], 0 }
   0x2   :  { %17 = vsyncpa [#allocation3 + $0x1], 0  ;;  %s1091_s30 = smov 0   ;;  %s1093_s10 = smov 0  }
   0x3   :  { %s1095_s11 = smov 0   ;;  %s1097_s12 = smov 0  }
   0x4   :  { %s1099_s13 = smov 0   ;;  %s1101_s14 = smov 0  }
   0x5 LB: > { %s829_s15 = sadd.s32 4294967295, %s1037_s14   ;;  %s830_s16 = sadd.s32 4294967294, %s1037_s14   ;;  %s1037_s14 = sphi %s1101_s14, %s23_s14   ;;  %s1033_s13 = sphi %s1099_s13, %s1285_s13   ;;  %s1029_s12 = sphi %s1097_s12, %s1284_s12   ;;  %s1025_s11 = sphi %s1095_s11, %s1283_s11   ;;  %s1021_s10 = sphi %s1093_s10, %s1282_s10   ;;  %s1017_s30 = sphi %s1091_s30, %s1281_s30  }
   0x6   : > { %s35_s17 = sadd.s32 1, %s1033_s13  ;;  %s240_s18 = sadd.s32 1, %s1025_s11 }
   0x7   : > { %p37_p0 = scmp.ge.s32.totalorder %s35_s17, 2  ;;  %p250_p1 = scmp.ne.s32.totalorder %s1025_s11, %s1021_s10 }
   0x8   : > { %p251_p2 = scmp.eq.s32.totalorder %s829_s15, 1  ;;  %p256_p3 = scmp.ne.s32.totalorder %s1021_s10, %s1017_s30 }
   0x9   : > { %s1287_s17 = smov (%p37_p0, %s35_s17), 0  ;;  %p257_p5 = scmp.eq.s32.totalorder %s830_s16, 1 }
   0xa   : > { %p1131_p4 = por %p251_p2, %p250_p1  ;;  %s235_s20 = ssub.s32 %s1033_s13, %s1287_s17 }
   0xb   : > { %p831_p6 = scmp.ge.s32.totalorder %s1037_s14, 1  ;;  %p238_p7 = scmp.eq.s32.totalorder %s235_s20, 0 }
   0xc   : > { %p1138_p8 = por %p257_p5, %p256_p3  ;;  %p264_p9 = scmp.lt.s32.totalorder %s1037_s14, 3 }
   0xd   : > { %s1144_s22 = scalar_select %p238_p7, %s1025_s11, %s240_s18  }
   0xe   : > { %p265_p10 = pnand %p831_p6, %p264_p9  ;;  %p868_p11 = scmp.eq.s32.totalorder %s829_s15, 0 }
   0xf   : > { %s276_s25 = sshll.u32 %s1269_s0, 4  ;;  %s1039_s26 = smov [#allocation2]   ;;  %s277_s25 = int_to_ptr.vmem [resolvable:$true] %s276_s25 }
  0x10   : > { %p860_p12 = pneg %p265_p10  ;;  %323 = sbr.rel (%p265_p10) target bundleno = 432 (0x1b0), region = 56 }
  0x12   : > { %p861_p13 = pnand %p868_p11, %p860_p12 }
  0x14   : > { %863 = dma.vmem_to_smem (!%p861_p13), %s277_s25, 16, %s1039_s26, [#allocation4]  }
  0x15   : > { %1008 = dma.done.wait (%p868_p11), [#allocation4], 16  }
  0x16   : > { %1010 = vsyncadd (%p868_p11), [#allocation4], 4294967280 }
  0x17   : > { %330 = sfence }
  0x18   : > { %p366_p0 = scmp.lt.s32.totalorder %s1029_s12, 1  ;;  %v1040_v0 = vmov 0   ;;  %v512_v1 = vld [vmem:[%s1272_s3 + $0x8] sm:$0xff]  ;;  %s705_s18 = sld [smem:[#allocation2 + %s1029_s12]]  ;;  %v511_v4 = vld [vmem:[%s1272_s3] sm:$0xff]  ;;  %vm390_vm0 = vcmask 1043456  }
  0x19   : > { %921 = vset.pattern.permute.xlu0 %v1040_v0  ;;  %922 = vset.pattern.permute.xlu1 %v1040_v0  ;;  %v528_v2 = vld [vmem:[%s1273_s4 + $0x8] sm:$0xff]  ;;  %v527_v5 = vld [vmem:[%s1273_s4] sm:$0xff]  ;;  %vm383_vm1 = vcmask 31744   ;;  %vm580_vm8 = vcmask 130048   ;;  %s853_s23 = sshll.u32 %s1029_s12, 3 }
  0x1a   : > { %s367_s16 = scalar_select %p366_p0, %s1029_s12, 1  ;;  %520 = vperm.xlu0 %921, %v512_v1   ;;  %536 = vperm.xlu1 %922, %v528_v2   ;;  %v704_v6 = vld [vmem:[%s1277_s8] sm:$0xf]  ;;  %v378_v12 = vld [vmem:[%s1271_s2 + $0x8] sm:$0xff] }
  0x1b   : > { %923 = vset.pattern.permute.xlu2 %v1040_v0  ;;  %v377_v8 = vld [vmem:[%s1271_s2] sm:$0xff] }
  0x1c   : > { %s852_s20 = sshll.u32 %s367_s16, 3  ;;  %s362_s16 = sand.u32 1, %s1021_s10  }
  0x1d   : > { %s373_s25 = scalar_lea.vmem %s1270_s1, %s852_s20  ;;  %s836_s20 = sshll.u32 %s362_s16, 3 }
  0x1e   : > { %v1161_v3 = vld [vmem:[%s373_s25] sm:$0xff]  ;;  %v706_v7 = vstv %s705_s18  ;;  %s736_s18 = scalar_lea.hbm %s1278_s9, %s853_s23  ;;  %s364_s26 = scalar_lea.vmem [#allocation5], %s836_s20 }
  0x1f   : > { %380 = vst [vmem:[#allocation1] ss:$2 sm:$0xff] %v1161_v3  ;;  %v707_v11 = vmul.f32 %v706_v7, %v704_v6  ;;  %s738_s27 = sshll.u32 %s364_s26, 4  ;;  %s740_s28 = sshll.u32 %s736_s18, 4  ;;  %s739_s27 = int_to_ptr.vmem [resolvable:$true] %s738_s27  ;;  %s741_s28 = int_to_ptr.hbm [resolvable:$true] %s740_s28 }
  0x20   : > { %s723_s12 = scalar_lea.sflag [#allocation3], %s362_s16  ;;  %s969_s29 = sshra.s32 %s741_s28, 4  ;;  %s970_s29 = int_to_ptr.hbm [resolvable:$true] %s969_s29 }
  0x21   : > { %s971_s15 = scalar_lea.hbm %s970_s29, 8  ;;  %s975_s20 = scalar_lea.hbm %s1278_s9, 16 }
  0x22   : > { %515 = vperm.xlu0 %921, %v511_v4   ;;  %531 = vperm.xlu1 %922, %v527_v5   ;;  %p972_p1 = scmp.ne.s32.totalorder %s970_s29, %s971_s15  ;;  %p976_p5 = scmp.lt.s32.totalorder %s970_s29, %s1278_s9 }
  0x23   : > { %p977_p6 = scmp.lt.s32.totalorder %s975_s20, %s971_s15 }
  0x24   : > { %p973_p2 = pnand %p972_p1, %p1131_p4 }
  0x25   : > { %p978_p7 = por %p977_p6, %p976_p5 }
  0x26   : > { %v381_v9 = vld.sshfl [vmem:[#allocation1] sm:$0xff pattern:$0x75316420]  ;;  %v382_v10 = vld.sshfl [vmem:[#allocation1 + $0x8] sm:$0xff pattern:$0x75316420]  ;;  %p974_p3 = pneg %p973_p2 }
  0x27   : > { %839 = vmatpush.msk.msra.mxu0 %vm390_vm0, %v381_v9  ;;  %842 = vmatpush.msk.msra.mxu1 %vm390_vm0, %v382_v10 }
  0x28   : > { %840 = vmatmul.msk.f32.vlgmr.msra.gmra.mxu0 %vm383_vm1, %v377_v8  ;;  %843 = vmatmul.msk.f32.vlgmr.msra.gmra.mxu1 %vm383_vm1, %v377_v8  ;;  %p979_p9 = pnand %p978_p7, %p974_p3 }
  0x2a   : > { %710 = vperm.xlu0 %921, %v707_v11  }
  0x30   : > { %841 = vmatmul.msk.f32.gmra.mxu0 %vm383_vm1, %v378_v12  ;;  %844 = vmatmul.msk.f32.gmra.mxu1 %vm383_vm1, %v378_v12 }
  0x8c   : > { %v521_v63 = vpop.permute.xlu0 %520  ;;  %v537_v4 = vpop.permute.xlu1 %536 }
  0xa5   : > { %v1181_v13 = vpop.f32.mrf.mxu0  ;;  %v1183_v14 = vpop.f32.mrf.mxu1 }
  0xa6   : > { %v457_v15 = vmul.f32 %v1181_v13, %v1181_v13  ;;  %v458_v16 = vmul.f32 %v1183_v14, %v1183_v14 }
  0xad   : > { %v1189_v17 = vpop.f32.mrf.mxu0  ;;  %v1191_v18 = vpop.f32.mrf.mxu1 }
  0xae   : > { %v441_v19 = vadd.f32 %v1189_v17, %v1181_v13  ;;  %v459_v20 = vmul.f32 %v1189_v17, %v1189_v17  ;;  %v448_v21 = vadd.f32 %v1191_v18, %v1183_v14  ;;  %v460_v22 = vmul.f32 %v1191_v18, %v1191_v18 }
  0xb0   : > { %v442_v23 = vrot.slane %v441_v19, 4  ;;  %v461_v24 = vadd.f32 %v459_v20, %v457_v15  ;;  %v449_v25 = vrot.slane %v448_v21, 4  ;;  %v468_v26 = vadd.f32 %v460_v22, %v458_v16 }
  0xb2   : > { %v443_v27 = vadd.f32 %v442_v23, %v441_v19  ;;  %v462_v28 = vrot.slane %v461_v24, 4  ;;  %v450_v29 = vadd.f32 %v449_v25, %v448_v21  ;;  %v469_v30 = vrot.slane %v468_v26, 4  ;;  %v688_v19 = vld [vmem:[%s1275_s6] sm:$0xf]  ;;  %v516_v23 = vpop.permute.xlu0 %515 }
  0xb3   : > { %691 = vperm.xlu2 %923, %v688_v19  }
  0xb4   : > { %v444_v31 = vrot.slane %v443_v27, 2  ;;  %v463_v32 = vadd.f32 %v462_v28, %v461_v24  ;;  %v451_v33 = vrot.slane %v450_v29, 2  ;;  %v470_v34 = vadd.f32 %v469_v30, %v468_v26 }
  0xb6   : > { %v445_v35 = vadd.f32 %v444_v31, %v443_v27  ;;  %v464_v36 = vrot.slane %v463_v32, 2  ;;  %v452_v37 = vadd.f32 %v451_v33, %v450_v29  ;;  %v471_v38 = vrot.slane %v470_v34, 2  ;;  %v696_v31 = vld [vmem:[%s1276_s7] sm:$0xf] }
  0xb8   : > { %v446_v39 = vrot.slane %v445_v35, 1  ;;  %v465_v40 = vadd.f32 %v464_v36, %v463_v32  ;;  %v453_v41 = vrot.slane %v452_v37, 1  ;;  %v472_v42 = vadd.f32 %v471_v38, %v470_v34 }
  0xba   : > { %v447_v43 = vadd.f32 %v446_v39, %v445_v35  ;;  %v466_v44 = vrot.slane %v465_v40, 1  ;;  %v454_v45 = vadd.f32 %v453_v41, %v452_v37  ;;  %v473_v46 = vrot.slane %v472_v42, 1 }
  0xbb   : > { %699 = vperm.xlu2 %923, %v696_v31  }
  0xbc   : > { %v455_v47 = vmul.f32 0.0625, %v447_v43  ;;  %v467_v48 = vadd.f32 %v466_v44, %v465_v40  ;;  %v456_v49 = vmul.f32 0.0625, %v454_v45  ;;  %v474_v50 = vadd.f32 %v473_v46, %v472_v42 }
  0xbe   : > { %v475_v51 = vmul.f32 0.0625, %v467_v48  ;;  %v477_v52 = vmul.f32 %v455_v47, %v455_v47  ;;  %v476_v53 = vmul.f32 0.0625, %v474_v50  ;;  %v478_v54 = vmul.f32 %v456_v49, %v456_v49 }
  0xbf   : > { %v483_v9 = vsub.f32 %v1189_v17, %v455_v47  ;;  %v481_v11 = vsub.f32 %v1181_v13, %v455_v47  ;;  %v484_v12 = vsub.f32 %v1191_v18, %v456_v49  ;;  %v482_v16 = vsub.f32 %v1183_v14, %v456_v49  ;;  %v532_v18 = vpop.permute.xlu1 %531 }
  0xc0   : > { %v479_v55 = vsub.f32 %v475_v51, %v477_v52  ;;  %v480_v56 = vsub.f32 %v476_v53, %v478_v54 }
  0xc2   : > { %v485_v57 = vadd.f32 1e-06, %v479_v55  ;;  %v486_v58 = vadd.f32 1e-06, %v480_v56 }
  0xc4   : > { %924 = vrsqrt.f32 %v485_v57  ;;  %vm493_vm4 = vweird.f32 %v485_v57  ;;  %vm503_vm6 = vweird.f32 %v486_v58 }
  0xc5   : > { %926 = vrsqrt.f32 %v486_v58 }
  0xca   : > { %v925_v59 = vpop.eup %924 }
  0xcb   : > { %v927_v60 = vpop.eup %926  ;;  %v488_v61 = vmul.f32 %v925_v59, %v485_v57  ;;  %vm494_vm2 = vweird.f32 %v925_v59 }
  0xcc   : > { %v498_v62 = vmul.f32 %v927_v60, %v486_v58  ;;  %vm504_vm3 = vweird.f32 %v927_v60  ;;  %vm495_vm5 = vmor %vm493_vm4, %vm494_vm2 }
  0xcd   : > { %v489_v0 = vmul.f32 %v925_v59, %v488_v61  ;;  %vm505_vm7 = vmor %vm503_vm6, %vm504_vm3 }
  0xce   : > { %v499_v1 = vmul.f32 %v927_v60, %v498_v62 }
  0xcf   : > { %v490_v2 = vmul.f32 0.5, %v489_v0 }
  0xd0   : > { %v500_v5 = vmul.f32 0.5, %v499_v1 }
  0xd1   : > { %v491_v6 = vsub.f32 1.5, %v490_v2 }
  0xd2   : > { %v501_v7 = vsub.f32 1.5, %v500_v5 }
  0xd3   : > { %v492_v8 = vmul.f32 %v925_v59, %v491_v6 }
  0xd4   : > { %v502_v10 = vmul.f32 %v927_v60, %v501_v7 }
  0xd5   : > { %v496_v15 = vsel %vm495_vm5, %v925_v59, %v492_v8 }
  0xd6   : > { %v506_v20 = vsel %vm505_vm7, %v927_v60, %v502_v10  ;;  %v509_v21 = vmul.f32 %v496_v15, %v483_v9  ;;  %v507_v22 = vmul.f32 %v496_v15, %v481_v11 }
  0xd7   : > { %v510_v17 = vmul.f32 %v506_v20, %v484_v12  ;;  %v508_v24 = vmul.f32 %v506_v20, %v482_v16 }
  0xd8   : > { %v525_v25 = vmul.f32 %v521_v63, %v509_v21  ;;  %v523_v26 = vmul.f32 %v516_v23, %v507_v22 }
  0xd9   : > { %v526_v13 = vmul.f32 %v521_v63, %v510_v17  ;;  %v524_v27 = vmul.f32 %v516_v23, %v508_v24 }
  0xda   : > { %v541_v28 = vadd.f32 %v537_v4, %v525_v25  ;;  %v539_v29 = vadd.f32 %v532_v18, %v523_v26 }
  0xdb   : > { %v542_v30 = vadd.f32 %v537_v4, %v526_v13  ;;  %v540_v14 = vadd.f32 %v532_v18, %v524_v27  ;;  %v579_v4 = vld [vmem:[%s1274_s5] sm:$0xf] }
  0xdc   : > { %v549_v32 = vmul.f32 0.044715, %v541_v28  ;;  %v547_v33 = vmul.f32 0.044715, %v539_v29  ;;  %v545_v54 = vmul.f32 0.5, %v541_v28  ;;  %v543_v61 = vmul.f32 0.5, %v539_v29 }
  0xdd   : > { %v550_v34 = vmul.f32 0.044715, %v542_v30  ;;  %v548_v35 = vmul.f32 0.044715, %v540_v14  ;;  %v546_v57 = vmul.f32 0.5, %v542_v30  ;;  %v544_v0 = vmul.f32 0.5, %v540_v14 }
  0xde   : > { %v553_v36 = vmul.f32 %v549_v32, %v541_v28  ;;  %v551_v37 = vmul.f32 %v547_v33, %v539_v29 }
  0xdf   : > { %v554_v38 = vmul.f32 %v550_v34, %v542_v30  ;;  %v552_v39 = vmul.f32 %v548_v35, %v540_v14 }
  0xe0   : > { %v557_v40 = vmul.f32 %v553_v36, %v541_v28  ;;  %v555_v41 = vmul.f32 %v551_v37, %v539_v29 }
  0xe1   : > { %v558_v42 = vmul.f32 %v554_v38, %v542_v30  ;;  %v556_v43 = vmul.f32 %v552_v39, %v540_v14 }
  0xe2   : > { %v561_v44 = vadd.f32 %v557_v40, %v541_v28  ;;  %v559_v45 = vadd.f32 %v555_v41, %v539_v29 }
  0xe3   : > { %v562_v46 = vadd.f32 %v558_v42, %v542_v30  ;;  %v560_v47 = vadd.f32 %v556_v43, %v540_v14 }
  0xe4   : > { %v565_v48 = vmul.f32 0.7978846, %v561_v44  ;;  %v563_v49 = vmul.f32 0.7978846, %v559_v45 }
  0xe5   : > { %v566_v50 = vmul.f32 0.7978846, %v562_v46  ;;  %v564_v51 = vmul.f32 0.7978846, %v560_v47 }
  0xe6   : > { %928 = vtanh.f32 %v565_v48 }
  0xe7   : > { %930 = vtanh.f32 %v566_v50 }
  0xe8   : > { %932 = vtanh.f32 %v563_v49 }
  0xe9   : > { %934 = vtanh.f32 %v564_v51 }
  0xec   : > { %v929_v52 = vpop.eup %928 }
  0xed   : > { %v931_v53 = vpop.eup %930  ;;  %v573_v55 = vadd.f32 1.0, %v929_v52 }
  0xee   : > { %v933_v56 = vpop.eup %932  ;;  %v574_v58 = vadd.f32 1.0, %v931_v53 }
  0xef   : > { %v935_v59 = vpop.eup %934  ;;  %v577_v60 = vmul.f32 %v573_v55, %v545_v54  ;;  %v571_v62 = vadd.f32 1.0, %v933_v56 }
  0xf0   : > { %v578_v63 = vmul.f32 %v574_v58, %v546_v57  ;;  %v572_v1 = vadd.f32 1.0, %v935_v59 }
  0xf1   : > { %598 = vmatpush.msra.mxu2 %v577_v60  ;;  %v575_v2 = vmul.f32 %v571_v62, %v543_v61 }
  0xf2   : > { %618 = vmatpush.msra.mxu3 %v578_v63  ;;  %v576_v5 = vmul.f32 %v572_v1, %v544_v0 }
  0xf3   : > { %599 = vmatpush.msra.mxu2 %v575_v2 }
  0xf4   : > { %619 = vmatpush.msra.mxu3 %v576_v5  ;;  %845 = vmatmul.msk.f32.vlgmr.msra.gmra.mxu2 %vm580_vm8, %v579_v4 }
  0xf5   : > { %846 = vmatmul.msk.f32.vlgmr.msra.gmra.mxu3 %vm580_vm8, %v579_v4 }
 0x10d   : > { %v692_v55 = vpop.permute.xlu2 %691 }
 0x177   : > { %v1214_v6 = vpop.f32.mrf.mxu2 }
 0x178   : > { %v624_v7 = vsel %vm390_vm0, %v1214_v6, 0.0  ;;  %v640_v8 = vmul.f32 %v1214_v6, %v1214_v6  ;;  %v1220_v9 = vpop.f32.mrf.mxu3 }
 0x179   : > { %v625_v10 = vrot.slane %v624_v7, 4  ;;  %v631_v11 = vsel %vm390_vm0, %v1220_v9, 0.0  ;;  %v641_v12 = vmul.f32 %v1220_v9, %v1220_v9 }
 0x17a   : > { %v642_v15 = vsel %vm390_vm0, %v640_v8, 0.0  ;;  %v632_v16 = vrot.slane %v631_v11, 4 }
 0x17b   : > { %v626_v19 = vadd.f32 %v625_v10, %v624_v7  ;;  %v643_v20 = vrot.slane %v642_v15, 4  ;;  %v649_v21 = vsel %vm390_vm0, %v641_v12, 0.0  ;;  %v700_v7 = vpop.permute.xlu2 %699 }
 0x17c   : > { %v633_v22 = vadd.f32 %v632_v16, %v631_v11  ;;  %v650_v17 = vrot.slane %v649_v21, 4  ;;  %v711_v11 = vpop.permute.xlu0 %710 }
 0x17d   : > { %v627_v23 = vrot.slane %v626_v19, 2  ;;  %v644_v24 = vadd.f32 %v643_v20, %v642_v15 }
 0x17e   : > { %v634_v25 = vrot.slane %v633_v22, 2  ;;  %v651_v26 = vadd.f32 %v650_v17, %v649_v21 }
 0x17f   : > { %v628_v13 = vadd.f32 %v627_v23, %v626_v19  ;;  %v645_v27 = vrot.slane %v644_v24, 2 }
 0x180   : > { %v635_v18 = vadd.f32 %v634_v25, %v633_v22  ;;  %v652_v28 = vrot.slane %v651_v26, 2 }
 0x181   : > { %v629_v29 = vrot.slane %v628_v13, 1  ;;  %v646_v30 = vadd.f32 %v645_v27, %v644_v24 }
 0x182   : > { %v636_v14 = vrot.slane %v635_v18, 1  ;;  %v653_v31 = vadd.f32 %v652_v28, %v651_v26 }
 0x183   : > { %v630_v32 = vadd.f32 %v629_v29, %v628_v13  ;;  %v647_v33 = vrot.slane %v646_v30, 1 }
 0x184   : > { %v637_v34 = vadd.f32 %v636_v14, %v635_v18  ;;  %v654_v35 = vrot.slane %v653_v31, 1 }
 0x185   : > { %v638_v36 = vmul.f32 0.25, %v630_v32  ;;  %v648_v37 = vadd.f32 %v647_v33, %v646_v30 }
 0x186   : > { %v639_v38 = vmul.f32 0.25, %v637_v34  ;;  %v655_v39 = vadd.f32 %v654_v35, %v653_v31 }
 0x187   : > { %v656_v40 = vmul.f32 0.25, %v648_v37  ;;  %v658_v41 = vmul.f32 %v638_v36, %v638_v36  ;;  %v662_v60 = vsub.f32 %v1214_v6, %v638_v36 }
 0x188   : > { %v657_v42 = vmul.f32 0.25, %v655_v39  ;;  %v659_v43 = vmul.f32 %v639_v38, %v639_v38  ;;  %v663_v62 = vsub.f32 %v1220_v9, %v639_v38 }
 0x189   : > { %v660_v44 = vsub.f32 %v656_v40, %v658_v41 }
 0x18a   : > { %v661_v45 = vsub.f32 %v657_v42, %v659_v43 }
 0x18b   : > { %v664_v46 = vadd.f32 1e-06, %v660_v44 }
 0x18c   : > { %v665_v47 = vadd.f32 1e-06, %v661_v45 }
 0x18d   : > { %936 = vrsqrt.f32 %v664_v46  ;;  %vm672_vm11 = vweird.f32 %v664_v46 }
 0x18e   : > { %938 = vrsqrt.f32 %v665_v47  ;;  %vm682_vm13 = vweird.f32 %v665_v47 }
 0x193   : > { %v937_v48 = vpop.eup %936 }
 0x194   : > { %v939_v49 = vpop.eup %938  ;;  %v667_v50 = vmul.f32 %v937_v48, %v664_v46  ;;  %vm673_vm9 = vweird.f32 %v937_v48 }
 0x195   : > { %v677_v51 = vmul.f32 %v939_v49, %v665_v47  ;;  %vm683_vm10 = vweird.f32 %v939_v49  ;;  %vm674_vm12 = vmor %vm672_vm11, %vm673_vm9 }
 0x196   : > { %v668_v52 = vmul.f32 %v937_v48, %v667_v50  ;;  %vm684_vm14 = vmor %vm682_vm13, %vm683_vm10 }
 0x197   : > { %v678_v53 = vmul.f32 %v939_v49, %v677_v51 }
 0x198   : > { %v669_v54 = vmul.f32 0.5, %v668_v52 }
 0x199   : > { %v679_v56 = vmul.f32 0.5, %v678_v53 }
 0x19a   : > { %v670_v57 = vsub.f32 1.5, %v669_v54 }
 0x19b   : > { %v680_v58 = vsub.f32 1.5, %v679_v56 }
 0x19c   : > { %v671_v59 = vmul.f32 %v937_v48, %v670_v57 }
 0x19d   : > { %v681_v61 = vmul.f32 %v939_v49, %v680_v58 }
 0x19e   : > { %v675_v63 = vsel %vm674_vm12, %v937_v48, %v671_v59 }
 0x19f   : > { %v685_v0 = vsel %vm684_vm14, %v939_v49, %v681_v61  ;;  %v686_v1 = vmul.f32 %v675_v63, %v662_v60 }
 0x1a0   : > { %v687_v2 = vmul.f32 %v685_v0, %v663_v62 }
 0x1a1   : > { %v694_v4 = vmul.f32 %v692_v55, %v686_v1 }
 0x1a2   : > { %v695_v5 = vmul.f32 %v692_v55, %v687_v2 }
 0x1a3   : > { %v702_v8 = vadd.f32 %v700_v7, %v694_v4 }
 0x1a4   : > { %v703_v10 = vadd.f32 %v700_v7, %v695_v5 }
 0x1a5   : > { %v713_v9 = vmul.f32 %v711_v11, %v702_v8 }
 0x1a6   : > { %v714_v6 = vmul.f32 %v711_v11, %v703_v10 }
 0x1a8   : > { %v717_v12 = vrot.slane %v714_v6, 4 }
 0x1aa   : > { %v718_v15 = vsel %vm390_vm0, %v713_v9, %v717_v12 }
 0x1ab   : > { %v720_v16 = vadd.f32 %v718_v15, %v1161_v3 }
 0x1ad   : > { %721 = vst [vmem:[%s364_s26] sm:$0xff] %v720_v16 }
 0x1ae   : > { %982 = shalt.err (!%p979_p9)
}
 0x1af   : > { %858 = dma.vmem_to_hbm [thread:$0]  (%p1131_p4), %s739_s27, 128, %s741_s28, %s723_s12  }
 0x1b0 PF: > { %p870_p10 = scmp.ge.s32.totalorder %s1037_s14, 2  ;;  %s752_s16 = sand.u32 1, %s1017_s30  }
 0x1b1   : > { %s753_s26 = scalar_lea.sflag [#allocation3], %s752_s16 }
 0x1b2   : > { %p865_p11 = pnand %p870_p10, %p1138_p8 }
 0x1b4   : > { %p866_p12 = pneg %p865_p11 }
 0x1b6   : > { %1012 = dma.done.wait (%p866_p12), %s753_s26, 128  }
 0x1b7   : > { %1014 = vsyncadd (%p866_p12), %s753_s26, 4294967168  ;;  %s23_s14 = sadd.s32 1, %s1037_s14   ;;  %s1281_s30 = smov %s1021_s10 }
 0x1b8   : > { %p20_p13 = scmp.ge.s32.totalorder %s23_s14, 4   ;;  %s1282_s10 = smov %s1025_s11 }
 0x1b9   : > { %s1283_s11 = smov %s1144_s22  ;;  %s1284_s12 = smov %s1033_s13 }
 0x1ba   : > { %s1285_s13 = smov %s1287_s17  ;;  %22 = sbr.rel (!%p20_p13) target bundleno = 5 (0x5), region = 96 }
 0x1bf   :  { %759 = vsyncpa [#allocation3], 1 }
 0x1c0   :  { %761 = vsyncpa [#allocation3 + $0x1], 1 }
 0x1c1   :  { %762 = vsyncpa [#allocation4], 1 }
 0x1c2   :  { %764 = vsyncpa [#allocation4 + $0x1], 1 }

</bundles_post_ra>
